<compile_context>
chip_gen: v7x
topology: tpu7x:2x2x1
jax: 0.10.0
libtpu: 0.0.40
codegen_flags: <defaults>
</compile_context>

<pallas_src>
import functools

import jax
import jax.numpy as jnp
from jax import lax
from jax.experimental import pallas as pl
from jax.experimental.pallas import tpu as pltpu

LANES = 128          # lane width (fast axis)
MAX_TILE_ROWS = 512  # rows per block; 512x128 f32 = 256 KiB, well inside VMEM
NUM_CORES = 2        # leading "parallel" axis for megacore (v7x); no-op on 1-TC chips


def _round_up(x, m):
    return ((x + m - 1) // m) * m


def _bce_kernel(x_ref, t_ref, o_ref, *, w0, w1, n_total, tile_rows,
                blocks_per_core, has_padding):
    """Weighted BCE partial sums, accumulated per-lane into the output block.

    x_ref : VMEM (tile_rows, 128) float32 logits tile
    t_ref : VMEM (tile_rows, 128) bfloat16 targets tile (0/1)
    o_ref : VMEM (1, 8, 128) float32 per-core per-lane partial sums
            (resident across the reduction axis j; written back per core c)
    """
    c = pl.program_id(0)   # core / parallel axis
    j = pl.program_id(1)   # reduction axis (arbitrary)

    @pl.when(j == 0)
    def _():
        o_ref[...] = jnp.zeros_like(o_ref)

    x = x_ref[...].astype(jnp.float32)
    t = t_ref[...].astype(jnp.float32)

    # Stable softplus: softplus(x) = max(x,0) + log(1 + exp(-|x|))
    #   -log(sigmoid(x))     = softplus(-x) = softplus(x) - x
    #   -log(1 - sigmoid(x)) = softplus(x)
    sp = jnp.maximum(x, 0.0) + jnp.log(1.0 + jnp.exp(-jnp.abs(x)))
    loss = t * (w1 * (sp - x)) + (1.0 - t) * (w0 * sp)

    if has_padding:
        # Mask out zero-padded tail elements (flat index >= n_total).
        global_block = c * blocks_per_core + j
        base = global_block * (tile_rows * LANES)
        row_ids = lax.broadcasted_iota(jnp.int32, (tile_rows, LANES), 0)
        lane_ids = lax.broadcasted_iota(jnp.int32, (tile_rows, LANES), 1)
        flat_idx = base + row_ids * LANES + lane_ids
        loss = jnp.where(flat_idx < n_total, loss, 0.0)

    # Pure-VPU reduction of the tile down to one (8,128) vreg; accumulate into
    # the resident output block. The single cross-lane reduce happens in the
    # wrapper after the kernel.
    partial = loss.reshape(tile_rows // 8, 8, LANES).sum(axis=0)
    o_ref[0] += partial


def binary_cross_entropy(inputs, targets, weight=None, size_average=True):
    """Pallas implementation of BinaryCrossEntropy.forward."""
    if weight is None:
        w0, w1 = 1.0, 1.0
    else:
        weight = jnp.asarray(weight, dtype=jnp.float32)
        # TODO(synk): weights folded as compile-time constants; a traced /
        # per-step weight would need an SMEM operand instead.
        w0 = float(weight[0])
        w1 = float(weight[1])

    n_total = int(inputs.size)

    # Tiling: flatten row-major into a lane-dense (rows, 128) slab.
    rows_needed = pl.cdiv(n_total, LANES)
    tile_rows = min(MAX_TILE_ROWS, _round_up(rows_needed, 8))
    blocks_per_core = max(1, pl.cdiv(rows_needed, tile_rows * NUM_CORES))
    padded_rows = NUM_CORES * blocks_per_core * tile_rows
    padded_total = padded_rows * LANES
    has_padding = padded_total > n_total

    x_flat = inputs.reshape(-1).astype(jnp.float32)
    # Targets are 0/1 -> bfloat16 is lossless and halves the DMA bytes.
    t_flat = targets.reshape(-1).astype(jnp.bfloat16)
    if has_padding:
        pad = padded_total - n_total
        x_flat = jnp.pad(x_flat, (0, pad))
        t_flat = jnp.pad(t_flat, (0, pad))
    x2d = x_flat.reshape(padded_rows, LANES)
    t2d = t_flat.reshape(padded_rows, LANES)

    kernel = functools.partial(
        _bce_kernel, w0=w0, w1=w1, n_total=n_total, tile_rows=tile_rows,
        blocks_per_core=blocks_per_core, has_padding=has_padding)

    cost = pl.CostEstimate(
        flops=8 * n_total,
        transcendentals=2 * n_total,
        bytes_accessed=4 * n_total + 2 * n_total + NUM_CORES * 8 * LANES * 4)

    partials = pl.pallas_call(
        kernel,
        out_shape=jax.ShapeDtypeStruct((NUM_CORES, 8, LANES), jnp.float32),
        grid_spec=pltpu.PrefetchScalarGridSpec(
            num_scalar_prefetch=0,
            grid=(NUM_CORES, blocks_per_core),
            in_specs=[
                pl.BlockSpec((tile_rows, LANES),
                             lambda c, j: (c * blocks_per_core + j, 0)),
                pl.BlockSpec((tile_rows, LANES),
                             lambda c, j: (c * blocks_per_core + j, 0)),
            ],
            out_specs=pl.BlockSpec((1, 8, LANES), lambda c, j: (c, 0, 0)),
        ),
        compiler_params=pltpu.CompilerParams(
            dimension_semantics=("parallel", "arbitrary")),
        cost_estimate=cost,
    )(x2d, t2d)

    total = jnp.sum(partials)  # single tiny cross-lane reduce, outside kernel
    if size_average:
        total = total / jnp.float32(n_total)
    return total


def _reference(inputs, targets, weight, size_average=True):
    # Naive formulation, matching the PyTorch module (safe for these inputs).
    p = jax.nn.sigmoid(inputs.astype(jnp.float32))
    t = targets.astype(jnp.float32)
    loss = -jnp.log(p) * t * weight[1] - (1.0 - t) * jnp.log(1.0 - p) * weight[0]
    return jnp.mean(loss) if size_average else jnp.sum(loss)


if __name__ == "__main__":
    key = jax.random.PRNGKey(0)
    k_x, k_t = jax.random.split(key)

    # NCHW logits and binary targets, small shapes.
    x = jax.random.normal(k_x, (2, 4, 16, 16), dtype=jnp.float32)
    t = (jax.random.uniform(k_t, (2, 4, 16, 16)) > 0.5).astype(jnp.float32)
    w = jnp.array([1.0, 1.0], dtype=jnp.float32)  # module default weight

    loss = binary_cross_entropy(x, t, weight=w, size_average=True)
    loss = jax.block_until_ready(loss)

    ref = _reference(x, t, w, size_average=True)
    assert jnp.allclose(loss, ref, rtol=1e-5, atol=1e-6), (loss, ref)

    # Also check size_average=False (sum reduction).
    loss_sum = jax.block_until_ready(
        binary_cross_entropy(x, t, weight=w, size_average=False))
    ref_sum = _reference(x, t, w, size_average=False)
    assert jnp.allclose(loss_sum, ref_sum, rtol=1e-5, atol=1e-4), (loss_sum, ref_sum)

    print("KERNEL_OK")
</pallas_src>

<mosaic_0001>
module attributes {stable_mosaic.version = 11 : i64} {
  func.func @_bce_kernel(%arg0: i32, %arg1: i32, %arg2: memref<16x128xf32, #tpu.memory_space<vmem>>, %arg3: memref<16x128xbf16, #tpu.memory_space<vmem>>, %arg4: memref<1x8x128xf32, #tpu.memory_space<vmem>>) attributes {dimension_semantics = [#tpu.dimension_semantics<parallel>, #tpu.dimension_semantics<arbitrary>], iteration_bounds = array<i64: 2, 1>, scalar_prefetch = 0 : i64, scratch_operands = 0 : i64, tpu.core_type = #tpu.core_type<tc>, window_params = [{transform_indices = @transform_0, window_bounds = array<i64: 16, 128>}, {transform_indices = @transform_1, window_bounds = array<i64: 16, 128>}, {transform_indices = @transform_2, window_bounds = array<i64: 1, 8, 128>}]} {
    %c0_i32 = arith.constant 0 : i32
    %0 = arith.cmpi eq, %arg1, %c0_i32 : i32
    %1 = arith.extui %0 : i1 to i32
    %c0_i32_0 = arith.constant 0 : i32
    %2 = arith.cmpi ne, %1, %c0_i32_0 : i32
    scf.if %2 {
      %cst_18 = arith.constant 0.000000e+00 : f32
      %48 = vector.broadcast %cst_18 : f32 to vector<1x8x128xf32>
      %c0_19 = arith.constant 0 : index
      %c0_20 = arith.constant 0 : index
      %c0_21 = arith.constant 0 : index
      %49 = vector.load %arg4[%c0_19, %c0_20, %c0_21] : memref<1x8x128xf32, #tpu.memory_space<vmem>>, vector<1x8x128xf32>
      tpu.vector_store %arg4[%c0_19, %c0_20, %c0_21], %48 {strides = array<i32>} : memref<1x8x128xf32, #tpu.memory_space<vmem>>, vector<1x8x128xf32>,
    } else {
    }
    %c0 = arith.constant 0 : index
    %c0_1 = arith.constant 0 : index
    %3 = vector.load %arg2[%c0, %c0_1] : memref<16x128xf32, #tpu.memory_space<vmem>>, vector<16x128xf32>
    %c0_2 = arith.constant 0 : index
    %c0_3 = arith.constant 0 : index
    %4 = vector.load %arg3[%c0_2, %c0_3] : memref<16x128xbf16, #tpu.memory_space<vmem>>, vector<16x128xbf16>
    %5 = arith.extf %4 : vector<16x128xbf16> to vector<16x128xf32>
    %cst = arith.constant 0.000000e+00 : f32
    %6 = vector.broadcast %cst : f32 to vector<16x128xf32>
    %7 = arith.maximumf %3, %6 : vector<16x128xf32>
    %8 = math.absf %3 : vector<16x128xf32>
    %cst_4 = arith.constant 0.000000e+00 : f32
    %9 = vector.broadcast %cst_4 : f32 to vector<16x128xf32>
    %10 = arith.subf %9, %8 : vector<16x128xf32>
    %11 = math.exp %10 : vector<16x128xf32>
    %cst_5 = arith.constant 1.000000e+00 : f32
    %12 = vector.broadcast %cst_5 : f32 to vector<16x128xf32>
    %13 = arith.addf %12, %11 : vector<16x128xf32>
    %14 = math.log %13 : vector<16x128xf32>
    %15 = arith.addf %7, %14 : vector<16x128xf32>
    %16 = arith.subf %15, %3 : vector<16x128xf32>
    %cst_6 = arith.constant 1.000000e+00 : f32
    %17 = vector.broadcast %cst_6 : f32 to vector<16x128xf32>
    %18 = arith.mulf %17, %16 : vector<16x128xf32>
    %19 = arith.mulf %5, %18 : vector<16x128xf32>
    %cst_7 = arith.constant 1.000000e+00 : f32
    %20 = vector.broadcast %cst_7 : f32 to vector<16x128xf32>
    %21 = arith.subf %20, %5 : vector<16x128xf32>
    %cst_8 = arith.constant 1.000000e+00 : f32
    %22 = vector.broadcast %cst_8 : f32 to vector<16x128xf32>
    %23 = arith.mulf %22, %15 : vector<16x128xf32>
    %24 = arith.mulf %21, %23 : vector<16x128xf32>
    %25 = arith.addf %19, %24 : vector<16x128xf32>
    %c1_i32 = arith.constant 1 : i32
    %26 = arith.muli %arg0, %c1_i32 : i32
    %27 = arith.addi %26, %arg1 : i32
    %c2048_i32 = arith.constant 2048 : i32
    %28 = arith.muli %27, %c2048_i32 : i32
    %29 = tpu.iota {dimensions = array<i32: 0>} : vector<16x128xi32>
    %30 = tpu.iota {dimensions = array<i32: 1>} : vector<16x128xi32>
    %c128_i32 = arith.constant 128 : i32
    %31 = vector.broadcast %c128_i32 : i32 to vector<16x128xi32>
    %32 = arith.muli %29, %31 : vector<16x128xi32>
    %33 = vector.broadcast %28 : i32 to vector<16x128xi32>
    %34 = arith.addi %33, %32 : vector<16x128xi32>
    %35 = arith.addi %34, %30 : vector<16x128xi32>
    %c2048_i32_9 = arith.constant 2048 : i32
    %36 = vector.broadcast %c2048_i32_9 : i32 to vector<16x128xi32>
    %37 = arith.cmpi slt, %35, %36 : vector<16x128xi32>
    %cst_10 = arith.constant 0.000000e+00 : f32
    %38 = vector.broadcast %cst_10 : f32 to vector<16x128xf32>
    %39 = arith.select %37, %25, %38 : vector<16x128xi1>, vector<16x128xf32>
    %40 = vector.shape_cast %39 : vector<16x128xf32> to vector<2x8x128xf32>
    %cst_11 = arith.constant dense<0.000000e+00> : vector<8x128xf32>
    %41 = vector.multi_reduction <add>, %40, %cst_11 [0] : vector<2x8x128xf32> to vector<8x128xf32>
    %c0_12 = arith.constant 0 : index
    %c0_13 = arith.constant 0 : index
    %c0_14 = arith.constant 0 : index
    %42 = vector.load %arg4[%c0_12, %c0_13, %c0_14] : memref<1x8x128xf32, #tpu.memory_space<vmem>>, vector<1x8x128xf32>
    %43 = vector.shape_cast %42 : vector<1x8x128xf32> to vector<8x128xf32>
    %44 = arith.addf %43, %41 : vector<8x128xf32>
    %c0_15 = arith.constant 0 : index
    %c0_16 = arith.constant 0 : index
    %c0_17 = arith.constant 0 : index
    %45 = vector.load %arg4[%c0_15, %c0_16, %c0_17] : memref<1x8x128xf32, #tpu.memory_space<vmem>>, vector<1x8x128xf32>
    %46 = vector.shape_cast %45 : vector<1x8x128xf32> to vector<8x128xf32>
    %47 = vector.shape_cast %44 : vector<8x128xf32> to vector<1x8x128xf32>
    tpu.vector_store %arg4[%c0_15, %c0_16, %c0_17], %47 {strides = array<i32>} : memref<1x8x128xf32, #tpu.memory_space<vmem>>, vector<1x8x128xf32>,
    return
  }
  func.func @transform_0(%arg0: i32, %arg1: i32) -> (i32, i32) {
    %c1_i32 = arith.constant 1 : i32
    %0 = arith.muli %arg0, %c1_i32 : i32
    %1 = arith.addi %0, %arg1 : i32
    %c0_i32 = arith.constant 0 : i32
    %c0_i32_0 = arith.constant 0 : i32
    return %1, %c0_i32 : i32, i32
  }
  func.func @transform_1(%arg0: i32, %arg1: i32) -> (i32, i32) {
    %c1_i32 = arith.constant 1 : i32
    %0 = arith.muli %arg0, %c1_i32 : i32
    %1 = arith.addi %0, %arg1 : i32
    %c0_i32 = arith.constant 0 : i32
    %c0_i32_0 = arith.constant 0 : i32
    return %1, %c0_i32 : i32, i32
  }
  func.func @transform_2(%arg0: i32, %arg1: i32) -> (i32, i32, i32) {
    %c0_i32 = arith.constant 0 : i32
    %c0_i32_0 = arith.constant 0 : i32
    %c0_i32_1 = arith.constant 0 : i32
    return %arg0, %c0_i32, %c0_i32_0 : i32, i32, i32
  }
}

</mosaic_0001>

<bundles_post_ra>
// kernel: tpu_custom_call.1
= control target key start
LH: loop header
LB: loop body
LE: loop exit
PB: predicated region body
PF: predicated region fallthrough
CT: control target
= control target key end

     0   :  { %7 = vsyncpa [#allocation3], 0  ;;  %s905_s0 = inlined_call_operand.hbm [shape: f32[32,128], index: 0, kind: input, shape index: {}]   ;;  %s906_s1 = inlined_call_operand.hbm [shape: bf16[32,128], index: 1, kind: input, shape index: {}]   ;;  %s907_s2 = inlined_call_operand.hbm [shape: f32[2,8,128], index: 2, kind: output, shape index: {}]  }
   0x1   :  { %9 = vsyncpa [#allocation3 + $0x1], 0 }
   0x2   :  { %10 = vsyncpa [#allocation6], 0 }
   0x3   :  { %12 = vsyncpa [#allocation6 + $0x1], 0 }
   0x4   :  { %13 = vsyncpa [#allocation4], 0 }
   0x5   :  { %15 = vsyncpa [#allocation4 + $0x1], 0  ;;  %s677_s9 = smov 0   ;;  %s679_s10 = smov 0  }
   0x6   :  { %s681_s11 = smov 0   ;;  %s683_s12 = smov 0  }
   0x7   :  { %s685_s13 = smov 0   ;;  %s687_s14 = smov 0  }
   0x8 LB: > { %s402_s15 = sadd.s32 4294967295, %s653_s14   ;;  %s403_s16 = sadd.s32 4294967294, %s653_s14   ;;  %s653_s14 = sphi %s687_s14, %s21_s14   ;;  %s649_s13 = sphi %s685_s13, %s925_s13   ;;  %s645_s12 = sphi %s683_s12, %s924_s12   ;;  %s641_s11 = sphi %s681_s11, %s923_s11   ;;  %s637_s10 = sphi %s679_s10, %s922_s10   ;;  %s633_s9 = sphi %s677_s9, %s921_s9  }
   0x9   : > { %s33_s17 = sadd.s32 1, %s649_s13  ;;  %s42_s18 = sadd.s32 1, %s641_s11 }
   0xa   : > { %p35_p0 = scmp.ge.s32.totalorder %s33_s17, 2  ;;  %p49_p1 = scmp.ne.s32.totalorder %s641_s11, %s637_s10 }
   0xb   : > { %p50_p2 = scmp.eq.s32.totalorder %s653_s14, 0  ;;  %p55_p3 = scmp.ne.s32.totalorder %s637_s10, %s633_s9 }
   0xc   : > { %s927_s17 = smov (%p35_p0, %s33_s17), 0  ;;  %p56_p5 = scmp.eq.s32.totalorder %s402_s15, 0 }
   0xd   : > { %p718_p4 = por %p50_p2, %p49_p1  ;;  %s39_s20 = ssub.s32 %s649_s13, %s927_s17 }
   0xe   : > { %p107_p6 = scmp.eq.s32.totalorder %s402_s15, 1  ;;  %p40_p7 = scmp.eq.s32.totalorder %s39_s20, 0 }
   0xf   : > { %p724_p8 = por %p56_p5, %p55_p3  ;;  %p113_p10 = scmp.eq.s32.totalorder %s403_s16, 1 }
  0x10   : > { %p728_p9 = por %p107_p6, %p49_p1  ;;  %p444_p13 = scmp.lt.s32.totalorder %s653_s14, 2 }
  0x11   : > { %s911_s21 = scalar_select %p724_p8, 1, 0 }
  0x12   : > { %s912_s22 = scalar_select %p728_p9, 1, 0 }
  0x13   : > { %s733_s23 = scalar_select %p40_p7, %s641_s11, %s42_s18  }
  0x14   : > { %p735_p11 = por %p113_p10, %p55_p3  ;;  %s742_s25 = sand.u32 1, %s641_s11  }
  0x15   : > { %s406_s26 = sshll.u32 %s742_s25, 4  ;;  %s421_s27 = sshll.u32 %s649_s13, 8 }
  0x16   : > { %s913_s24 = scalar_select %p735_p11, 1, 0 }
  0x17   : > { %s749_s30 = scalar_lea.hbm %s905_s0, %s421_s27  ;;  %s137_s3 = scalar_lea.vmem [#allocation2], %s406_s26 }
  0x18   : > { %s145_s4 = sshll.u32 %s137_s3, 4  ;;  %p755_p0 = pnand %p444_p13, %p718_p4  ;;  %s751_s4 = int_to_ptr.vmem [resolvable:$true] %s145_s4 }
  0x19   : > { %s134_s6 = scalar_lea.sflag [#allocation3], %s742_s25  ;;  %s507_s7 = scalar_lea.hbm %s749_s30, 256 }
  0x1a   : > { %p508_p2 = scmp.ne.s32.totalorder %s749_s30, %s507_s7  ;;  %p509_p3 = pneg %p755_p0 }
  0x1b   : > { %s512_s16 = scalar_lea.hbm %s905_s0, 512  ;;  %p513_p4 = scmp.lt.u32.totalorder %s749_s30, %s905_s0 }
  0x1c   : > { %p510_p5 = pnand %p509_p3, %p508_p2  ;;  %p514_p7 = scmp.lt.u32.totalorder %s512_s16, %s507_s7 }
  0x1d   : > { %p516_p13 = scmp.lt.u32.totalorder %s507_s7, %s749_s30 }
  0x1e   : > { %p511_p6 = pneg %p510_p5  ;;  %p515_p10 = por %p514_p7, %p513_p4 }
  0x20   : > { %p517_p12 = por %p516_p13, %p515_p10 }
  0x22   : > { %p518_p1 = pnand %p517_p12, %p511_p6 }
  0x24   : > { %521 = shalt.err (!%p518_p1)
}
  0x25   : > { %s522_s20 = scalar_lea.vmem %s751_s4, 256  ;;  %s655_s26 = smov [#allocation2]  }
  0x26   : > { %p523_p2 = scmp.ne.s32.totalorder %s751_s4, %s522_s20  ;;  %s527_s27 = sshll.u32 %s655_s26, 4  ;;  %s528_s27 = int_to_ptr.vmem [resolvable:$false] %s527_s27 }
  0x27   : > { %s529_s28 = scalar_lea.vmem %s528_s27, 512  ;;  %p530_p9 = scmp.lt.s32.totalorder %s751_s4, %s528_s27 }
  0x28   : > { %p525_p5 = pnand %p523_p2, %p509_p3  ;;  %p531_p4 = scmp.lt.s32.totalorder %s529_s28, %s522_s20 }
  0x2a   : > { %p526_p11 = pneg %p525_p5  ;;  %p532_p7 = por %p531_p4, %p530_p9 }
  0x2c   : > { %p533_p10 = pnand %p532_p7, %p526_p11 }
  0x2e   : > { %536 = shalt.err (!%p533_p10)
}
  0x2f   : > { %s656_s29 = smov 128   ;;  %s657_s3 = smov 8  }
  0x30   : > { %436 = dma.hbm_to_vmem [thread:$0]  (!%p755_p0), %s749_s30, 256, %s751_s4, %s134_s6, %s656_s29, %s656_s29, %s657_s3  }
  0x31   : > { %p175_p12 = scmp.lt.s32.totalorder %s653_s14, 3  ;;  %s409_s7 = sshll.u32 %s742_s25, 3 }
  0x32   : > { %s422_s8 = sshll.u32 %s649_s13, 7  ;;  %p915_p9 = scmp.ge.s32.totalorder %s653_s14, 1 }
  0x33   : > { %s800_s19 = scalar_lea.hbm %s906_s1, %s422_s8  ;;  %s159_s20 = scalar_lea.vmem [#allocation5], %s409_s7 }
  0x34   : > { %p793_p11 = pnand %p915_p9, %p175_p12  ;;  %s167_s26 = sshll.u32 %s159_s20, 4  ;;  %s802_s26 = int_to_ptr.vmem [resolvable:$true] %s167_s26 }
  0x35   : > { %s156_s30 = scalar_lea.sflag [#allocation6], %s742_s25  ;;  %s537_s4 = scalar_lea.hbm %s800_s19, 128 }
  0x36   : > { %p538_p1 = scmp.ne.s32.totalorder %s800_s19, %s537_s4  ;;  %s542_s28 = scalar_lea.hbm %s906_s1, 256 }
  0x37   : > { %p543_p2 = scmp.lt.u32.totalorder %s800_s19, %s906_s1  ;;  %p544_p5 = scmp.lt.u32.totalorder %s542_s28, %s537_s4 }
  0x38   : > { %p540_p6 = pnand %p538_p1, %p509_p3  ;;  %p546_p7 = scmp.lt.u32.totalorder %s537_s4, %s800_s19 }
  0x39   : > { %p545_p4 = por %p544_p5, %p543_p2 }
  0x3a   : > { %p541_p13 = pneg %p540_p6 }
  0x3b   : > { %p547_p10 = por %p546_p7, %p545_p4 }
  0x3d   : > { %p548_p12 = pnand %p547_p10, %p541_p13 }
  0x3f   : > { %551 = shalt.err (!%p548_p12)
}
  0x40   : > { %s552_s7 = scalar_lea.vmem %s802_s26, 128  ;;  %s658_s8 = smov [#allocation5]  }
  0x41   : > { %p553_p9 = scmp.ne.s32.totalorder %s802_s26, %s552_s7  ;;  %s557_s16 = sshll.u32 %s658_s8, 4  ;;  %s558_s16 = int_to_ptr.vmem [resolvable:$false] %s557_s16 }
  0x42   : > { %s559_s18 = scalar_lea.vmem %s558_s16, 256  ;;  %p560_p8 = scmp.lt.s32.totalorder %s802_s26, %s558_s16 }
  0x43   : > { %p555_p1 = pnand %p553_p9, %p509_p3  ;;  %p561_p2 = scmp.lt.s32.totalorder %s559_s18, %s552_s7 }
  0x45   : > { %p556_p6 = pneg %p555_p1  ;;  %p562_p5 = por %p561_p2, %p560_p8 }
  0x47   : > { %p563_p4 = pnand %p562_p5, %p556_p6 }
  0x49   : > { %566 = shalt.err (!%p563_p4)
}
  0x4a   : > { %s659_s20 = smov 64   ;;  %s660_s4 = smov 4  }
  0x4b   : > { %439 = dma.hbm_to_vmem [thread:$0]  (!%p755_p0), %s800_s19, 128, %s802_s26, %s156_s30, %s659_s20, %s659_s20, %s660_s4  }
  0x4c   : > { %179 = sbr.rel (%p793_p11) target bundleno = 146 (0x92), region = 28  ;;  %s833_s6 = sand.u32 (!%p793_p11), 1, %s637_s10  }
  0x4d   : > { %s413_s27 = sshll.u32 (!%p793_p11), %s833_s6, 4  ;;  %s182_s28 = scalar_lea.sflag (!%p793_p11), [#allocation3], %s833_s6 }
  0x4e   : > { %s185_s29 = scalar_lea.vmem (!%p793_p11), [#allocation2], %s413_s27  ;;  %p917_p8 = scmp.ne.s32.totalorder (!%p793_p11), %s911_s21, 0 }
  0x53   : > { %620 = dma.done.wait (%p917_p8), %s182_s28, 256  }
  0x54   : > { %622 = vsyncadd (%p917_p8), %s182_s28, 4294967040  ;;  %s414_s25 = sshll.u32 %s833_s6, 3  ;;  %s191_s5 = scalar_lea.sflag [#allocation6], %s833_s6 }
  0x55   : > { %s194_s15 = scalar_lea.vmem [#allocation5], %s414_s25 }
  0x56   : > { %624 = dma.done.wait (%p917_p8), %s191_s5, 128  }
  0x57   : > { %626 = vsyncadd (%p917_p8), %s191_s5, 4294967168  ;;  %v229_v0 = vld [vmem:[%s185_s29] sm:$0xff]  ;;  %v230_v1 = vld [vmem:[%s185_s29 + $0x8] sm:$0xff]  ;;  %v265_v8 = vlaneseq  ;;  %s416_s21 = sshll.u32 %s645_s12, 11  ;;  %s418_s19 = sshll.u32 %s645_s12, 7 }
  0x58   : > { %v237_v2 = vand.u32 2147483647, %v229_v0  ;;  %v238_v3 = vand.u32 2147483647, %v230_v1  ;;  %v424_v15 = vld [vmem:[%s194_s15] sm:$0xff]   ;;  %v272_v19 = vstv %s416_s21  ;;  %v235_v21 = vmax.f32 %v229_v0, 0.0  ;;  %s856_s8 = scalar_lea.hbm %s907_s2, %s418_s19 }
  0x59   : > { %v266_v13 = vshrl.u32 %v265_v8, 7  ;;  %v425_v17 = vunpack.c.l.bf16 %v424_v15  ;;  %v426_v20 = vunpack.c.h.bf16 %v424_v15  ;;  %v236_v23 = vmax.f32 %v230_v1, 0.0  ;;  %s219_s26 = scalar_lea.vmem [#allocation7], %s414_s25  ;;  %s286_s16 = scalar_lea.sflag [#allocation4], %s833_s6 }
  0x5a   : > { %v239_v4 = vsub.f32 0.0, %v237_v2  ;;  %v240_v5 = vsub.f32 0.0, %v238_v3  ;;  %v269_v24 = vand.u32 127, %v265_v8  ;;  %s299_s30 = sshll.u32 %s219_s26, 4  ;;  %p918_p3 = scmp.ne.s32.totalorder %s912_s22, 0  ;;  %s858_s30 = int_to_ptr.vmem [resolvable:$true] %s299_s30 }
  0x5b   : > { %v267_v14 = vadd.s32 8, %v266_v13  ;;  %v270_v16 = vmul.u32 128, %v266_v13  ;;  %v257_v28 = vsub.f32 1.0, %v425_v17  ;;  %v258_v31 = vsub.f32 1.0, %v426_v20  ;;  %s567_s18 = scalar_lea.vmem %s858_s30, 128  ;;  %s661_s12 = smov [#allocation7]  }
  0x5c   : > { %v241_v6 = vmul.f32 1.442695, %v239_v4  ;;  %v243_v7 = vmul.f32 1.442695, %v240_v5  ;;  %p568_p0 = scmp.ne.s32.totalorder %s858_s30, %s567_s18  ;;  %s571_s20 = sshll.u32 %s661_s12, 4  ;;  %s572_s20 = int_to_ptr.vmem [resolvable:$false] %s571_s20 }
  0x5d   : > { %v271_v18 = vmul.u32 128, %v267_v14  ;;  %v273_v25 = vadd.s32 %v272_v19, %v270_v16  ;;  %s573_s4 = scalar_lea.vmem %s572_s20, 256  ;;  %p574_p7 = scmp.lt.s32.totalorder %s858_s30, %s572_s20 }
  0x5e   : > { %499 = vpow2.f32 %v241_v6  ;;  %p569_p11 = pnand %p568_p0, %p918_p3  ;;  %p575_p10 = scmp.lt.s32.totalorder %s573_s4, %s567_s18 }
  0x5f   : > { %501 = vpow2.f32 %v243_v7  ;;  %v274_v29 = vadd.s32 %v272_v19, %v271_v18  ;;  %v275_v34 = vadd.s32 %v273_v25, %v269_v24 }
  0x60   : > { %p570_p13 = pneg %p569_p11  ;;  %p576_p12 = por %p575_p10, %p574_p7 }
  0x61   : > { %v276_v37 = vadd.s32 %v274_v29, %v269_v24  ;;  %vm277_vm0 = vcmp.lt.s32.totalorder %v275_v34, 2048 }
  0x62   : > { %p577_p9 = pnand %p576_p12, %p570_p13 }
  0x63   : > { %vm278_vm1 = vcmp.lt.s32.totalorder %v276_v37, 2048 }
  0x68   : > { %v500_v9 = vpop.eup %499 }
  0x69   : > { %v502_v10 = vpop.eup %501  ;;  %v245_v11 = vadd.f32 1.0, %v500_v9 }
  0x6a   : > { %v246_v12 = vadd.f32 1.0, %v502_v10 }
  0x6b   : > { %503 = vlog2.f32 %v245_v11 }
  0x6c   : > { %505 = vlog2.f32 %v246_v12 }
  0x75   : > { %v504_v22 = vpop.eup %503 }
  0x76   : > { %v506_v26 = vpop.eup %505  ;;  %v248_v27 = vmul.f32 0.6931472, %v504_v22 }
  0x77   : > { %v250_v30 = vmul.f32 0.6931472, %v506_v26 }
  0x78   : > { %v251_v32 = vadd.f32 %v248_v27, %v235_v21 }
  0x79   : > { %v252_v33 = vadd.f32 %v250_v30, %v236_v23 }
  0x7a   : > { %v253_v35 = vsub.f32 %v251_v32, %v229_v0  ;;  %v259_v36 = vmul.f32 %v257_v28, %v251_v32 }
  0x7b   : > { %v254_v38 = vsub.f32 %v252_v33, %v230_v1  ;;  %v260_v39 = vmul.f32 %v258_v31, %v252_v33 }
  0x7c   : > { %v255_v40 = vmul.f32 %v425_v17, %v253_v35 }
  0x7d   : > { %v256_v41 = vmul.f32 %v426_v20, %v254_v38 }
  0x7e   : > { %v261_v42 = vadd.f32 %v259_v36, %v255_v40 }
  0x7f   : > { %v262_v43 = vadd.f32 %v260_v39, %v256_v41 }
  0x80   : > { %v279_v44 = vsel %vm277_vm0, %v261_v42, 0.0 }
  0x81   : > { %v280_v45 = vsel %vm278_vm1, %v262_v43, 0.0 }
  0x82   : > { %v281_v46 = vadd.f32 %v280_v45, %v279_v44 }
  0x84   : > { %284 = vst [vmem:[%s219_s26] sm:$0xff] %v281_v46 }
  0x85   : > { %580 = shalt.err (!%p577_p9)
}
  0x86   : > { %s581_s6 = scalar_lea.hbm %s856_s8, 128  ;;  %s585_s29 = scalar_lea.hbm %s907_s2, 256 }
  0x87   : > { %p582_p1 = scmp.ne.s32.totalorder %s856_s8, %s581_s6  ;;  %p586_p5 = scmp.lt.u32.totalorder %s856_s8, %s907_s2 }
  0x88   : > { %p587_p4 = scmp.lt.u32.totalorder %s585_s29, %s581_s6  ;;  %p589_p0 = scmp.lt.u32.totalorder %s581_s6, %s856_s8 }
  0x89   : > { %p583_p6 = pnand %p582_p1, %p918_p3 }
  0x8a   : > { %p588_p8 = por %p587_p4, %p586_p5 }
  0x8b   : > { %p584_p2 = pneg %p583_p6 }
  0x8c   : > { %p590_p11 = por %p589_p0, %p588_p8 }
  0x8e   : > { %p591_p13 = pnand %p590_p11, %p584_p2 }
  0x90   : > { %594 = shalt.err (!%p591_p13)
}
  0x91   : > { %431 = dma.vmem_to_hbm [thread:$0]  (%p918_p3), %s858_s30, 128, %s856_s8, %s286_s16  }
  0x92 PF: > { %s311_s15 = sand.u32 1, %s633_s9   ;;  %p919_p7 = scmp.ne.s32.totalorder %s913_s24, 0 }
  0x93   : > { %p920_p10 = scmp.ge.s32.totalorder %s653_s14, 2  ;;  %s312_s21 = scalar_lea.sflag [#allocation4], %s311_s15 }
  0x95   : > { %p441_p12 = pnand %p920_p10, %p919_p7 }
  0x97   : > { %628 = dma.done.wait (!%p441_p12), %s312_s21, 128  }
  0x98   : > { %630 = vsyncadd (!%p441_p12), %s312_s21, 4294967168  ;;  %s21_s14 = sadd.s32 1, %s653_s14   ;;  %s921_s9 = smov %s637_s10 }
  0x99   : > { %p18_p9 = scmp.ge.s32.totalorder %s21_s14, 4   ;;  %s922_s10 = smov %s641_s11 }
  0x9a   : > { %s923_s11 = smov %s733_s23  ;;  %s924_s12 = smov %s649_s13 }
  0x9b   : > { %s925_s13 = smov %s927_s17  ;;  %20 = sbr.rel (!%p18_p9) target bundleno = 8 (0x8), region = 90 }
  0xa2   :  { %317 = vsyncpa [#allocation3], 1 }
  0xa3   :  { %319 = vsyncpa [#allocation3 + $0x1], 1 }
  0xa4   :  { %320 = vsyncpa [#allocation6], 1 }
  0xa5   :  { %322 = vsyncpa [#allocation6 + $0x1], 1 }
  0xa6   :  { %323 = vsyncpa [#allocation4], 1 }
  0xa7   :  { %325 = vsyncpa [#allocation4 + $0x1], 1 }

</bundles_post_ra>
